<compile_context>
chip_gen: v7x
topology: tpu7x:2x2x1
jax: 0.10.0
libtpu: 0.0.40
codegen_flags: <defaults>
</compile_context>

<pallas_src>
import math

import jax
import jax.numpy as jnp
from jax.experimental import pallas as pl
from jax.experimental.pallas import tpu as pltpu

PMAX = 4  # max padding across the four branches (k=9 -> pad 4)


def _pick_row_tile(Ho):
    """Output-row tile: whole map when small, else a divisor multiple of 8."""
    if Ho <= 128:
        return Ho
    for cand in range(128, 7, -1):
        if Ho % cand == 0 and cand % 8 == 0:
            return cand
    return Ho  # full-dim block stays legal; rare (large Ho with no 8-mult div)


def _pick_batch_tile(N, TH, Kpad):
    """Largest batch fold with M = BT*TH <= 256, modest LHS scratch, and
    (when N >= 2) at least two parallel grid steps left for v7x megacore."""
    best = 1
    for bt in range(1, N + 1):
        if N % bt:
            continue
        m = bt * TH
        if m > 256 or m * 9 * Kpad * 2 > (8 << 20):
            continue
        if N // bt >= 2 or N == 1:
            best = bt
    return best


def _make_kernel(BT, TH, Kpad, WoC4, n_row_tiles):
    """Fused conv3/5/7/9 (stride 2) + bias + ReLU for one (batch, row) tile."""
    M = BT * TH

    def kernel(x_ref, w_ref, b_ref, o_ref, lhs_ref):
        # x_ref:   (BT, 2, Hph, Kpad)  bf16  H-parity phase planes, (W,Cin) flat
        # w_ref:   (9*Kpad, WoC4)      bf16  K-fused Toeplitz-packed weights
        # b_ref:   (1, WoC4)           f32
        # o_ref:   (BT, TH, WoC4)      f32
        # lhs_ref: (M, 9*Kpad)         bf16  VMEM scratch (K-fused LHS slab)
        if n_row_tiles == 1:
            row0 = 0
        else:
            row0 = pl.multiple_of(pl.program_id(1) * TH, TH)

        # Assemble the K-fused LHS: 9 row-shifted taps side by side along K,
        # batch tile stacked along M.  All destination offsets are static and
        # 8-sublane / 128-lane aligned.
        for bi in range(BT):
            for kh in range(9):
                ph, sh = kh % 2, kh // 2
                lhs_ref[bi * TH:(bi + 1) * TH, kh * Kpad:(kh + 1) * Kpad] = (
                    x_ref[bi, ph, pl.ds(row0 + sh, TH), :])

        # One deep MXU contraction: (M, 9*Kpad) x (9*Kpad, WoC4), f32 acc.
        acc = jnp.dot(lhs_ref[...], w_ref[...],
                      preferred_element_type=jnp.float32)
        out = jnp.maximum(acc + b_ref[...], 0.0)
        o_ref[...] = out.reshape(BT, TH, WoC4).astype(o_ref.dtype)

    return kernel


def _pack_weights(params, Cin, Wp, Wo, Kpad, dtype):
    """Fuse the 4 branches into one 9x9 frame, Toeplitz-expand along W, and
    order output lanes (branch, Cq, Wo) so Wo stays the minor output dim."""
    Cq = params["conv3"][0].shape[0]
    C4 = 4 * Cq
    WpCin = Wp * Cin

    # Unified 9x9 frame weights: (9, 9, Cin, 4, Cq), branch as its own dim.
    w9 = jnp.zeros((9, 9, Cin, 4, Cq), jnp.float32)
    for bi, k in enumerate((3, 5, 7, 9)):
        w, _ = params[f"conv{k}"]                       # OIHW: (Cq, Cin, k, k)
        w_hwio = jnp.transpose(w, (2, 3, 1, 0))         # (k, k, Cin, Cq)
        base = PMAX - (k - 1) // 2
        w9 = w9.at[base:base + k, base:base + k, :, bi, :].set(w_hwio)

    # big[kh, iw*Cin+ci, (b*Cq+cq)*Wo + ow] = w9[kh, iw-2*ow, ci, b, cq]
    # (zero outside the band).  Note: materializes a dense f32 intermediate
    # scaling O(W^2); fine for the small feature maps this block targets.
    iw = jnp.arange(Wp)[:, None, None]
    ow = jnp.arange(Wo)[None, :, None]
    kw = jnp.arange(9)[None, None, :]
    sel = (iw == 2 * ow + kw).astype(jnp.float32)       # (Wp, Wo, 9)
    big = jnp.einsum("iok,hkcbq->hicbqo", sel, w9)      # (9, Wp, Cin, 4, Cq, Wo)
    big = big.reshape(9, WpCin, C4 * Wo)
    big = jnp.pad(big, ((0, 0), (0, Kpad - WpCin), (0, 0)))   # K -> 128-multiple
    big = big.reshape(9 * Kpad, C4 * Wo).astype(dtype)

    # Bias per lane: value of (branch, cq), broadcast across the minor Wo dim.
    b4 = jnp.concatenate([params[f"conv{k}"][1] for k in (3, 5, 7, 9)], axis=0)
    bias = jnp.repeat(b4, Wo)[None, :]                  # (1, 4*Cq*Wo)
    return big, bias.astype(jnp.float32)


def wideblock_forward(x_nchw, params):
    """Exact Wideblock.forward semantics: (N,Cin,H,W) -> (4N, Cq, H//2, W//2)."""
    N, Cin, H, W = x_nchw.shape
    assert H % 2 == 0 and W % 2 == 0

    Ho, Wo = H // 2, W // 2
    Hp, Wp = H + 2 * PMAX, W + 2 * PMAX
    Hph = Hp // 2
    Cq = params["conv3"][0].shape[0]
    C4 = 4 * Cq
    WoC4 = Wo * C4
    WpCin = Wp * Cin
    Kpad = ((WpCin + 127) // 128) * 128

    # NCHW -> padded NHWC -> H-parity phase planes with (W,Cin) flattened and
    # zero-padded to a 128-multiple along the contraction dim.
    # TODO(synk): fold this rearrangement into the kernel via manual DMA to
    # drop the wrapper-side HBM passes for large feature maps.
    x_nhwc = jnp.transpose(x_nchw, (0, 2, 3, 1))
    xp = jnp.pad(x_nhwc, ((0, 0), (PMAX, PMAX), (PMAX, PMAX), (0, 0)))
    xf = xp.reshape(N, Hph, 2, WpCin)
    xf = jnp.transpose(xf, (0, 2, 1, 3))
    xf = jnp.pad(xf, ((0, 0), (0, 0), (0, 0), (0, Kpad - WpCin)))
    xf = xf.astype(jnp.bfloat16)                        # (N, 2, Hph, Kpad)

    w_big, bias = _pack_weights(params, Cin, Wp, Wo, Kpad, jnp.bfloat16)

    TH = _pick_row_tile(Ho)
    nt = Ho // TH
    BT = _pick_batch_tile(N, TH, Kpad)
    nb = N // BT
    M = BT * TH
    kernel = _make_kernel(BT, TH, Kpad, WoC4, nt)

    # Honest conv FLOPs (excludes structural zeros of the Toeplitz packing).
    flops = 2 * N * Ho * Wo * Cq * Cin * (9 + 25 + 49 + 81)
    bytes_accessed = (xf.size * 2 + w_big.size * 2 + bias.size * 4
                      + N * Ho * WoC4 * 4)

    # VMEM budget (in/out blocks + resident weight/bias, double-buffered
    # worst case, plus the K-fused LHS scratch) with generous headroom.
    x_blk = BT * 2 * Hph * Kpad * 2
    o_blk = BT * TH * WoC4 * 4
    w_b = w_big.size * 2 + bias.size * 4
    lhs_b = M * 9 * Kpad * 2
    need = 2 * (x_blk + o_blk + w_b) + lhs_b
    vmem_limit = int(min(max(2 * need, 32 << 20), 100 << 20))

    out = pl.pallas_call(
        kernel,
        out_shape=jax.ShapeDtypeStruct((N, Ho, WoC4), jnp.float32),
        grid=(nb, nt),
        in_specs=[
            pl.BlockSpec((BT, 2, Hph, Kpad), lambda n, t: (n, 0, 0, 0)),
            pl.BlockSpec((9 * Kpad, WoC4), lambda n, t: (0, 0)),
            pl.BlockSpec((1, WoC4), lambda n, t: (0, 0)),
        ],
        out_specs=pl.BlockSpec((BT, TH, WoC4), lambda n, t: (n, t, 0)),
        scratch_shapes=[pltpu.VMEM((M, 9 * Kpad), jnp.bfloat16)],
        compiler_params=pltpu.CompilerParams(
            dimension_semantics=("parallel", "parallel"),
            vmem_limit_bytes=vmem_limit),
        cost_estimate=pl.CostEstimate(
            flops=flops, transcendentals=0, bytes_accessed=bytes_accessed),
    )(xf, w_big, bias)

    # (N, Ho, 4*Cq*Wo) -> (4N, Cq, Ho, Wo), matching torch.cat([...], dim=0).
    # Wo stays the minor dim throughout -> cheap major-axis permute only.
    y = out.reshape(N, Ho, 4, Cq, Wo)
    y = jnp.transpose(y, (2, 0, 3, 1, 4)).reshape(4 * N, Cq, Ho, Wo)
    return y


def wideblock_reference(x_nchw, params):
    """Pure-JAX f32 reference (mirrors the PyTorch forward)."""
    outs = []
    for k in (3, 5, 7, 9):
        w, b = params[f"conv{k}"]
        p = (k - 1) // 2
        y = jax.lax.conv_general_dilated(
            x_nchw, w, window_strides=(2, 2), padding=[(p, p), (p, p)],
            dimension_numbers=("NCHW", "OIHW", "NCHW"))
        outs.append(y + b[None, :, None, None])
    return jnp.maximum(jnp.concatenate(outs, axis=0), 0.0)


def init_params(key, in_channels, out_channels):
    """Deterministic PyTorch-Conv2d-style init (uniform +/- 1/sqrt(fan_in))."""
    Cq = out_channels // 4
    params = {}
    keys = jax.random.split(key, 8)
    i = 0
    for k in (3, 5, 7, 9):
        fan_in = in_channels * k * k
        bound = 1.0 / math.sqrt(fan_in)
        w = jax.random.uniform(
            keys[i], (Cq, in_channels, k, k), jnp.float32, -bound, bound)
        b = jax.random.uniform(keys[i + 1], (Cq,), jnp.float32, -bound, bound)
        params[f"conv{k}"] = (w, b)
        i += 2
    return params


if __name__ == "__main__":
    key = jax.random.PRNGKey(0)
    kx, kp = jax.random.split(key)

    N, Cin, H, W = 2, 4, 16, 16
    out_channels = 32

    x = jax.random.normal(kx, (N, Cin, H, W), jnp.float32)
    params = init_params(kp, Cin, out_channels)

    y = jax.block_until_ready(wideblock_forward(x, params))
    y_ref = jax.block_until_ready(wideblock_reference(x, params))

    assert y.shape == (4 * N, out_channels // 4, H // 2, W // 2), y.shape
    # bf16 MXU operands with f32 accumulation -> loosened tolerance vs f32 ref.
    max_err = float(jnp.max(jnp.abs(y - y_ref)))
    assert jnp.allclose(y, y_ref, atol=3e-2, rtol=3e-2), max_err
    print("KERNEL_OK")
</pallas_src>

<mosaic_0001>
module attributes {stable_mosaic.version = 11 : i64} {
  func.func @kernel(%arg0: i32, %arg1: i32, %arg2: memref<1x2x12x128xbf16, #tpu.memory_space<vmem>>, %arg3: memref<1152x256xbf16, #tpu.memory_space<vmem>>, %arg4: memref<1x256xf32, #tpu.memory_space<vmem>>, %arg5: memref<1x8x256xf32, #tpu.memory_space<vmem>>, %arg6: memref<8x1152xbf16, #tpu.memory_space<vmem>>) attributes {dimension_semantics = [#tpu.dimension_semantics<parallel>, #tpu.dimension_semantics<parallel>], iteration_bounds = array<i64: 2, 1>, scalar_prefetch = 0 : i64, scratch_operands = 1 : i64, tpu.core_type = #tpu.core_type<tc>, window_params = [{transform_indices = @transform_0, window_bounds = array<i64: 1, 2, 12, 128>}, {pipeline_mode = #tpu.pipeline_mode<synchronous>, transform_indices = @transform_1, window_bounds = array<i64: 1152, 256>}, {pipeline_mode = #tpu.pipeline_mode<synchronous>, transform_indices = @transform_2, window_bounds = array<i64: 1, 256>}, {transform_indices = @transform_3, window_bounds = array<i64: 1, 8, 256>}]} {
    %c0 = arith.constant 0 : index
    %c0_0 = arith.constant 0 : index
    %c0_1 = arith.constant 0 : index
    %c0_2 = arith.constant 0 : index
    %0 = vector.load %arg2[%c0, %c0_0, %c0_1, %c0_2] : memref<1x2x12x128xbf16, #tpu.memory_space<vmem>>, vector<1x1x8x128xbf16>
    %1 = vector.shape_cast %0 : vector<1x1x8x128xbf16> to vector<8x128xbf16>
    %c0_3 = arith.constant 0 : index
    %c0_4 = arith.constant 0 : index
    %2 = vector.load %arg6[%c0_3, %c0_4] : memref<8x1152xbf16, #tpu.memory_space<vmem>>, vector<8x128xbf16>
    tpu.vector_store %arg6[%c0_3, %c0_4], %1 {strides = array<i32>} : memref<8x1152xbf16, #tpu.memory_space<vmem>>, vector<8x128xbf16>,
    %c0_5 = arith.constant 0 : index
    %c1 = arith.constant 1 : index
    %c0_6 = arith.constant 0 : index
    %c0_7 = arith.constant 0 : index
    %3 = vector.load %arg2[%c0_5, %c1, %c0_6, %c0_7] : memref<1x2x12x128xbf16, #tpu.memory_space<vmem>>, vector<1x1x8x128xbf16>
    %4 = vector.shape_cast %3 : vector<1x1x8x128xbf16> to vector<8x128xbf16>
    %c0_8 = arith.constant 0 : index
    %c128 = arith.constant 128 : index
    %5 = vector.load %arg6[%c0_8, %c128] : memref<8x1152xbf16, #tpu.memory_space<vmem>>, vector<8x128xbf16>
    tpu.vector_store %arg6[%c0_8, %c128], %4 {strides = array<i32>} : memref<8x1152xbf16, #tpu.memory_space<vmem>>, vector<8x128xbf16>,
    %c0_9 = arith.constant 0 : index
    %c0_10 = arith.constant 0 : index
    %c1_11 = arith.constant 1 : index
    %c0_12 = arith.constant 0 : index
    %6 = vector.load %arg2[%c0_9, %c0_10, %c1_11, %c0_12] : memref<1x2x12x128xbf16, #tpu.memory_space<vmem>>, vector<1x1x8x128xbf16>
    %7 = vector.shape_cast %6 : vector<1x1x8x128xbf16> to vector<8x128xbf16>
    %c0_13 = arith.constant 0 : index
    %c256 = arith.constant 256 : index
    %8 = vector.load %arg6[%c0_13, %c256] : memref<8x1152xbf16, #tpu.memory_space<vmem>>, vector<8x128xbf16>
    tpu.vector_store %arg6[%c0_13, %c256], %7 {strides = array<i32>} : memref<8x1152xbf16, #tpu.memory_space<vmem>>, vector<8x128xbf16>,
    %c0_14 = arith.constant 0 : index
    %c1_15 = arith.constant 1 : index
    %c1_16 = arith.constant 1 : index
    %c0_17 = arith.constant 0 : index
    %9 = vector.load %arg2[%c0_14, %c1_15, %c1_16, %c0_17] : memref<1x2x12x128xbf16, #tpu.memory_space<vmem>>, vector<1x1x8x128xbf16>
    %10 = vector.shape_cast %9 : vector<1x1x8x128xbf16> to vector<8x128xbf16>
    %c0_18 = arith.constant 0 : index
    %c384 = arith.constant 384 : index
    %11 = vector.load %arg6[%c0_18, %c384] : memref<8x1152xbf16, #tpu.memory_space<vmem>>, vector<8x128xbf16>
    tpu.vector_store %arg6[%c0_18, %c384], %10 {strides = array<i32>} : memref<8x1152xbf16, #tpu.memory_space<vmem>>, vector<8x128xbf16>,
    %c0_19 = arith.constant 0 : index
    %c0_20 = arith.constant 0 : index
    %c2 = arith.constant 2 : index
    %c0_21 = arith.constant 0 : index
    %12 = vector.load %arg2[%c0_19, %c0_20, %c2, %c0_21] : memref<1x2x12x128xbf16, #tpu.memory_space<vmem>>, vector<1x1x8x128xbf16>
    %13 = vector.shape_cast %12 : vector<1x1x8x128xbf16> to vector<8x128xbf16>
    %c0_22 = arith.constant 0 : index
    %c512 = arith.constant 512 : index
    %14 = vector.load %arg6[%c0_22, %c512] : memref<8x1152xbf16, #tpu.memory_space<vmem>>, vector<8x128xbf16>
    tpu.vector_store %arg6[%c0_22, %c512], %13 {strides = array<i32>} : memref<8x1152xbf16, #tpu.memory_space<vmem>>, vector<8x128xbf16>,
    %c0_23 = arith.constant 0 : index
    %c1_24 = arith.constant 1 : index
    %c2_25 = arith.constant 2 : index
    %c0_26 = arith.constant 0 : index
    %15 = vector.load %arg2[%c0_23, %c1_24, %c2_25, %c0_26] : memref<1x2x12x128xbf16, #tpu.memory_space<vmem>>, vector<1x1x8x128xbf16>
    %16 = vector.shape_cast %15 : vector<1x1x8x128xbf16> to vector<8x128xbf16>
    %c0_27 = arith.constant 0 : index
    %c640 = arith.constant 640 : index
    %17 = vector.load %arg6[%c0_27, %c640] : memref<8x1152xbf16, #tpu.memory_space<vmem>>, vector<8x128xbf16>
    tpu.vector_store %arg6[%c0_27, %c640], %16 {strides = array<i32>} : memref<8x1152xbf16, #tpu.memory_space<vmem>>, vector<8x128xbf16>,
    %c0_28 = arith.constant 0 : index
    %c0_29 = arith.constant 0 : index
    %c3 = arith.constant 3 : index
    %c0_30 = arith.constant 0 : index
    %18 = vector.load %arg2[%c0_28, %c0_29, %c3, %c0_30] : memref<1x2x12x128xbf16, #tpu.memory_space<vmem>>, vector<1x1x8x128xbf16>
    %19 = vector.shape_cast %18 : vector<1x1x8x128xbf16> to vector<8x128xbf16>
    %c0_31 = arith.constant 0 : index
    %c768 = arith.constant 768 : index
    %20 = vector.load %arg6[%c0_31, %c768] : memref<8x1152xbf16, #tpu.memory_space<vmem>>, vector<8x128xbf16>
    tpu.vector_store %arg6[%c0_31, %c768], %19 {strides = array<i32>} : memref<8x1152xbf16, #tpu.memory_space<vmem>>, vector<8x128xbf16>,
    %c0_32 = arith.constant 0 : index
    %c1_33 = arith.constant 1 : index
    %c3_34 = arith.constant 3 : index
    %c0_35 = arith.constant 0 : index
    %21 = vector.load %arg2[%c0_32, %c1_33, %c3_34, %c0_35] : memref<1x2x12x128xbf16, #tpu.memory_space<vmem>>, vector<1x1x8x128xbf16>
    %22 = vector.shape_cast %21 : vector<1x1x8x128xbf16> to vector<8x128xbf16>
    %c0_36 = arith.constant 0 : index
    %c896 = arith.constant 896 : index
    %23 = vector.load %arg6[%c0_36, %c896] : memref<8x1152xbf16, #tpu.memory_space<vmem>>, vector<8x128xbf16>
    tpu.vector_store %arg6[%c0_36, %c896], %22 {strides = array<i32>} : memref<8x1152xbf16, #tpu.memory_space<vmem>>, vector<8x128xbf16>,
    %c0_37 = arith.constant 0 : index
    %c0_38 = arith.constant 0 : index
    %c4 = arith.constant 4 : index
    %c0_39 = arith.constant 0 : index
    %24 = vector.load %arg2[%c0_37, %c0_38, %c4, %c0_39] : memref<1x2x12x128xbf16, #tpu.memory_space<vmem>>, vector<1x1x8x128xbf16>
    %25 = vector.shape_cast %24 : vector<1x1x8x128xbf16> to vector<8x128xbf16>
    %c0_40 = arith.constant 0 : index
    %c1024 = arith.constant 1024 : index
    %26 = vector.load %arg6[%c0_40, %c1024] : memref<8x1152xbf16, #tpu.memory_space<vmem>>, vector<8x128xbf16>
    tpu.vector_store %arg6[%c0_40, %c1024], %25 {strides = array<i32>} : memref<8x1152xbf16, #tpu.memory_space<vmem>>, vector<8x128xbf16>,
    %c0_41 = arith.constant 0 : index
    %c0_42 = arith.constant 0 : index
    %27 = vector.load %arg6[%c0_41, %c0_42] : memref<8x1152xbf16, #tpu.memory_space<vmem>>, vector<8x1152xbf16>
    %c0_43 = arith.constant 0 : index
    %c0_44 = arith.constant 0 : index
    %28 = vector.load %arg3[%c0_43, %c0_44] : memref<1152x256xbf16, #tpu.memory_space<vmem>>, vector<1152x256xbf16>
    %cst = arith.constant dense<0.000000e+00> : vector<8x256xf32>
    %29 = tpu.matmul %27, %28, %cst {dimension_numbers = #tpu.dot_dimension_numbers<[1], [0], [0], [1], [0, 0, 1, 1], [], []>} : vector<8x1152xbf16>, vector<1152x256xbf16>, vector<8x256xf32> -> vector<8x256xf32>
    %c0_45 = arith.constant 0 : index
    %c0_46 = arith.constant 0 : index
    %30 = vector.load %arg4[%c0_45, %c0_46] : memref<1x256xf32, #tpu.memory_space<vmem>>, vector<1x256xf32>
    %31 = vector.broadcast %30 : vector<1x256xf32> to vector<8x256xf32>
    %32 = arith.addf %29, %31 : vector<8x256xf32>
    %cst_47 = arith.constant 0.000000e+00 : f32
    %33 = vector.broadcast %cst_47 : f32 to vector<8x256xf32>
    %34 = arith.maximumf %32, %33 : vector<8x256xf32>
    %35 = vector.shape_cast %34 : vector<8x256xf32> to vector<1x8x256xf32>
    %c0_48 = arith.constant 0 : index
    %c0_49 = arith.constant 0 : index
    %c0_50 = arith.constant 0 : index
    %36 = vector.load %arg5[%c0_48, %c0_49, %c0_50] : memref<1x8x256xf32, #tpu.memory_space<vmem>>, vector<1x8x256xf32>
    tpu.vector_store %arg5[%c0_48, %c0_49, %c0_50], %35 {strides = array<i32>} : memref<1x8x256xf32, #tpu.memory_space<vmem>>, vector<1x8x256xf32>,
    return
  }
  func.func @transform_0(%arg0: i32, %arg1: i32) -> (i32, i32, i32, i32) {
    %c0_i32 = arith.constant 0 : i32
    %c0_i32_0 = arith.constant 0 : i32
    %c0_i32_1 = arith.constant 0 : i32
    %c0_i32_2 = arith.constant 0 : i32
    return %arg0, %c0_i32, %c0_i32_0, %c0_i32_1 : i32, i32, i32, i32
  }
  func.func @transform_1(%arg0: i32, %arg1: i32) -> (i32, i32) {
    %c0_i32 = arith.constant 0 : i32
    %c0_i32_0 = arith.constant 0 : i32
    %c0_i32_1 = arith.constant 0 : i32
    return %c0_i32, %c0_i32_0 : i32, i32
  }
  func.func @transform_2(%arg0: i32, %arg1: i32) -> (i32, i32) {
    %c0_i32 = arith.constant 0 : i32
    %c0_i32_0 = arith.constant 0 : i32
    %c0_i32_1 = arith.constant 0 : i32
    return %c0_i32, %c0_i32_0 : i32, i32
  }
  func.func @transform_3(%arg0: i32, %arg1: i32) -> (i32, i32, i32) {
    %c0_i32 = arith.constant 0 : i32
    %c0_i32_0 = arith.constant 0 : i32
    return %arg0, %arg1, %c0_i32 : i32, i32, i32
  }
}

</mosaic_0001>

<bundles_post_ra>
// kernel: tpu_custom_call.1
= control target key start
LH: loop header
LB: loop body
LE: loop exit
PB: predicated region body
PF: predicated region fallthrough
CT: control target
= control target key end

     0   :  { %8 = vsyncpa [#allocation4], 0  ;;  %s2373_s0 = inlined_call_operand.vmem [shape: bf16[2,2,12,128], index: 0, kind: input, shape index: {}]   ;;  %s2374_s1 = inlined_call_operand.hbm [shape: bf16[1152,256], index: 1, kind: input, shape index: {}]   ;;  %s2375_s2 = inlined_call_operand.vmem [shape: f32[1,256], index: 2, kind: input, shape index: {}]   ;;  %s2376_s3 = inlined_call_operand.hbm [shape: f32[2,8,256], index: 3, kind: output, shape index: {}]  }
   0x1   :  { %9 = vsyncpa [#allocation5], 0 }
   0x2   :  { %11 = vsyncpa [#allocation5 + $0x1], 0  ;;  %s2174_s12 = smov 0   ;;  %s2176_s13 = smov 0  }
   0x3   :  { %s2178_s14 = smov 0   ;;  %s2180_s15 = smov 0  }
   0x4   :  { %s2182_s16 = smov 0   ;;  %s2184_s17 = smov 0  }
   0x5 LB: > { %s1547_s18 = sadd.s32 4294967295, %s2147_s17   ;;  %s1548_s19 = sadd.s32 4294967294, %s2147_s17   ;;  %s2147_s17 = sphi %s2184_s17, %s17_s17   ;;  %s2143_s16 = sphi %s2182_s16, %s2400_s16   ;;  %s2139_s15 = sphi %s2180_s15, %s2399_s15   ;;  %s2135_s14 = sphi %s2178_s14, %s2398_s14   ;;  %s2131_s13 = sphi %s2176_s13, %s2397_s13   ;;  %s2127_s12 = sphi %s2174_s12, %s2396_s12  }
   0x6   : > { %s29_s20 = sadd.s32 1, %s2143_s16  ;;  %s106_s21 = sadd.s32 1, %s2135_s14 }
   0x7   : > { %p31_p0 = scmp.ge.s32.totalorder %s29_s20, 2  ;;  %p116_p1 = scmp.ne.s32.totalorder %s2135_s14, %s2131_s13 }
   0x8   : > { %p117_p2 = scmp.eq.s32.totalorder %s1547_s18, 1  ;;  %p122_p3 = scmp.ne.s32.totalorder %s2131_s13, %s2127_s12 }
   0x9   : > { %s2402_s20 = smov (%p31_p0, %s29_s20), 0  ;;  %p123_p5 = scmp.eq.s32.totalorder %s1548_s19, 1 }
   0xa   : > { %p2214_p4 = por %p117_p2, %p116_p1  ;;  %s101_s23 = ssub.s32 %s2143_s16, %s2402_s20 }
   0xb   : > { %p1549_p6 = scmp.ge.s32.totalorder %s2147_s17, 1  ;;  %p104_p7 = scmp.eq.s32.totalorder %s101_s23, 0 }
   0xc   : > { %s2381_s22 = scalar_select %p2214_p4, 1, 0 }
   0xd   : > { %p2221_p8 = por %p123_p5, %p122_p3  ;;  %p130_p9 = scmp.lt.s32.totalorder %s2147_s17, 3 }
   0xe   : > { %s2227_s25 = scalar_select %p104_p7, %s2135_s14, %s106_s21  }
   0xf   : > { %s2382_s24 = scalar_select %p2221_p8, 1, 0 }
  0x10   : > { %p2229_p10 = pnand %p1549_p6, %p130_p9  ;;  %p2233_p11 = scmp.eq.s32.totalorder %s1547_s18, 0 }
  0x11   : > { %s2149_s28 = smov [#allocation3]   ;;  %s2037_s6 = scalar_lea.hbm %s2374_s1, 18432 }
  0x12   : > { %s2383_s26 = scalar_select %p2229_p10, 1, 0 }
  0x13   : > { %s2384_s27 = scalar_select %p2233_p11, 1, 0 }
  0x14   : > { %p1749_p12 = pneg %p2229_p10  ;;  %s142_s29 = sshll.u32 %s2149_s28, 4  ;;  %s143_s29 = int_to_ptr.vmem [resolvable:$true] %s142_s29 }
  0x15   : > { %p2038_p0 = scmp.ne.s32.totalorder %s2374_s1, %s2037_s6  ;;  %p2044_p5 = scmp.lt.u32.totalorder %s2037_s6, %s2374_s1 }
  0x16   : > { %p2241_p13 = pnand %p2233_p11, %p1749_p12 }
  0x18   : > { %p2039_p1 = pneg %p2241_p13 }
  0x1a   : > { %p2040_p2 = pnand %p2039_p1, %p2038_p0 }
  0x1c   : > { %p2041_p3 = pneg %p2040_p2 }
  0x1e   : > { %p2046_p6 = pnand %p2044_p5, %p2041_p3 }
  0x20   : > { %2049 = shalt.err (!%p2046_p6)
}
  0x21   : > { %s2050_s11 = scalar_lea.vmem %s143_s29, 18432  ;;  %p2058_p8 = scmp.lt.s32.totalorder %s143_s29, %s143_s29 }
  0x22   : > { %p2051_p7 = scmp.ne.s32.totalorder %s143_s29, %s2050_s11  ;;  %p2059_p4 = scmp.lt.s32.totalorder %s2050_s11, %s2050_s11 }
  0x24   : > { %p2053_p9 = pnand %p2051_p7, %p2039_p1  ;;  %p2060_p11 = por %p2059_p4, %p2058_p8 }
  0x26   : > { %p2054_p12 = pneg %p2053_p9 }
  0x28   : > { %p2061_p10 = pnand %p2060_p11, %p2054_p12 }
  0x2a   : > { %2064 = shalt.err (!%p2061_p10)
}
  0x2b   : > { %s2150_s18 = smov 128   ;;  %s2151_s19 = smov 8  }
  0x2c   : > { %1752 = dma.hbm_to_vmem [thread:$0]  (!%p2241_p13), %s2374_s1, 18432, %s143_s29, [#allocation4], %s2150_s18, %s2150_s18, %s2151_s19  }
  0x2d   : > { %p2386_p0 = scmp.ne.s32.totalorder %s2383_s26, 0 }
  0x2e   : > { %p2387_p2 = scmp.ne.s32.totalorder (!%p2386_p0), %s2384_s27, 0 }
  0x2f   : > { %169 = sbr.rel (%p2386_p0) target bundleno = 448 (0x1c0), region = 32 }
  0x36   : > { %2118 = dma.done.wait (%p2387_p2), [#allocation4], 18432  }
  0x37   : > { %2120 = vsyncadd (%p2387_p2), [#allocation4], 4294948864  ;;  %v1812_v0 = vld [vmem:[#allocation3 + $0x4] ss:$8 sps:$4 sm:$0xff]   ;;  %v1816_v2 = vld [vmem:[#allocation3] ss:$8 sps:$4 sm:$0xff]  }
  0x38   : > { %v1814_v1 = vld [vmem:[#allocation3 + $0x204] ss:$8 sps:$4 sm:$0xff]   ;;  %1239 = vmatprep.subr.bf16.mxu1 %v1812_v0  ;;  %v1817_v3 = vld [vmem:[#allocation3 + $0x200] ss:$8 sps:$4 sm:$0xff]   ;;  %v1818_v4 = vld [vmem:[#allocation3 + $0x14] ss:$8 sps:$4 sm:$0xff]  }
  0x39   : > { %1321 = vmatprep.subr.bf16.mxu0 %v1814_v1  ;;  %1240 = vmatpush1.bf16.msra.mxu1 %v1816_v2  ;;  %v1820_v5 = vld [vmem:[#allocation3 + $0x214] ss:$8 sps:$4 sm:$0xff]   ;;  %v1822_v6 = vld [vmem:[#allocation3 + $0x10] ss:$8 sps:$4 sm:$0xff]   ;;  %v1824_v8 = vld [vmem:[#allocation3 + $0x24] ss:$8 sps:$4 sm:$0xff]  }
  0x3a   : > { %1322 = vmatpush1.bf16.msra.mxu0 %v1817_v3  ;;  %1241 = vmatprep.subr.bf16.mxu1 %v1818_v4  ;;  %v1823_v7 = vld [vmem:[#allocation3 + $0x210] ss:$8 sps:$4 sm:$0xff]   ;;  %v1826_v9 = vld [vmem:[#allocation3 + $0x224] ss:$8 sps:$4 sm:$0xff]   ;;  %v1828_v10 = vld [vmem:[#allocation3 + $0x20] ss:$8 sps:$4 sm:$0xff]  }
  0x3b   : > { %1323 = vmatprep.subr.bf16.mxu0 %v1820_v5  ;;  %v1829_v11 = vld [vmem:[#allocation3 + $0x220] ss:$8 sps:$4 sm:$0xff]   ;;  %v1830_v12 = vld [vmem:[#allocation3 + $0x34] ss:$8 sps:$4 sm:$0xff]   ;;  %v1834_v14 = vld [vmem:[#allocation3 + $0x30] ss:$8 sps:$4 sm:$0xff]  }
  0x3c   : > { %v1832_v13 = vld [vmem:[#allocation3 + $0x234] ss:$8 sps:$4 sm:$0xff]   ;;  %v1835_v15 = vld [vmem:[#allocation3 + $0x230] ss:$8 sps:$4 sm:$0xff]   ;;  %v1836_v16 = vld [vmem:[#allocation3 + $0x44] ss:$8 sps:$4 sm:$0xff]  }
  0x3d   : > { %1242 = vmatpush1.bf16.msra.mxu1 %v1822_v6  ;;  %v1838_v17 = vld [vmem:[#allocation3 + $0x244] ss:$8 sps:$4 sm:$0xff]   ;;  %v1840_v18 = vld [vmem:[#allocation3 + $0x40] ss:$8 sps:$4 sm:$0xff]   ;;  %v1842_v20 = vld [vmem:[#allocation3 + $0x54] ss:$8 sps:$4 sm:$0xff]  }
  0x3e   : > { %1324 = vmatpush1.bf16.msra.mxu0 %v1823_v7  ;;  %1243 = vmatprep.subr.bf16.mxu1 %v1824_v8  ;;  %v1841_v19 = vld [vmem:[#allocation3 + $0x240] ss:$8 sps:$4 sm:$0xff]   ;;  %v1844_v21 = vld [vmem:[#allocation3 + $0x254] ss:$8 sps:$4 sm:$0xff]   ;;  %v1846_v22 = vld [vmem:[#allocation3 + $0x50] ss:$8 sps:$4 sm:$0xff]  }
  0x3f   : > { %1325 = vmatprep.subr.bf16.mxu0 %v1826_v9  ;;  %v1847_v23 = vld [vmem:[#allocation3 + $0x250] ss:$8 sps:$4 sm:$0xff]   ;;  %v1848_v24 = vld [vmem:[#allocation3 + $0x64] ss:$8 sps:$4 sm:$0xff]   ;;  %v1852_v26 = vld [vmem:[#allocation3 + $0x60] ss:$8 sps:$4 sm:$0xff]  }
  0x40   : > { %v1850_v25 = vld [vmem:[#allocation3 + $0x264] ss:$8 sps:$4 sm:$0xff]   ;;  %v1853_v27 = vld [vmem:[#allocation3 + $0x260] ss:$8 sps:$4 sm:$0xff]   ;;  %v1854_v28 = vld [vmem:[#allocation3 + $0x74] ss:$8 sps:$4 sm:$0xff]  }
  0x41   : > { %1244 = vmatpush1.bf16.msra.mxu1 %v1828_v10  ;;  %v1856_v29 = vld [vmem:[#allocation3 + $0x274] ss:$8 sps:$4 sm:$0xff]   ;;  %v1858_v30 = vld [vmem:[#allocation3 + $0x70] ss:$8 sps:$4 sm:$0xff]   ;;  %v1860_v32 = vld [vmem:[#allocation3 + $0x84] ss:$8 sps:$4 sm:$0xff]  }
  0x42   : > { %1326 = vmatpush1.bf16.msra.mxu0 %v1829_v11  ;;  %1245 = vmatprep.subr.bf16.mxu1 %v1830_v12  ;;  %v1859_v31 = vld [vmem:[#allocation3 + $0x270] ss:$8 sps:$4 sm:$0xff]   ;;  %v1862_v33 = vld [vmem:[#allocation3 + $0x284] ss:$8 sps:$4 sm:$0xff]   ;;  %p193_p4 = scmp.lt.s32.totalorder %s2139_s15, 1  ;;  %vm247_vm0 = vcmask 1042432  }
  0x43   : > { %1327 = vmatprep.subr.bf16.mxu0 %v1832_v13  ;;  %v1864_v34 = vld [vmem:[#allocation3 + $0x80] ss:$8 sps:$4 sm:$0xff]   ;;  %v1866_v36 = vld [vmem:[#allocation3 + $0x94] ss:$8 sps:$4 sm:$0xff]   ;;  %v1870_v38 = vld [vmem:[#allocation3 + $0x90] ss:$8 sps:$4 sm:$0xff]  }
  0x44   : > { %v1865_v35 = vld [vmem:[#allocation3 + $0x280] ss:$8 sps:$4 sm:$0xff]   ;;  %v1868_v37 = vld [vmem:[#allocation3 + $0x294] ss:$8 sps:$4 sm:$0xff]   ;;  %s194_s26 = scalar_select %p193_p4, %s2139_s15, 1  ;;  %vm248_vm1 = vcmask 1046532  }
  0x45   : > { %1246 = vmatpush1.bf16.msra.mxu1 %v1834_v14  ;;  %v1871_v39 = vld [vmem:[#allocation3 + $0x290] ss:$8 sps:$4 sm:$0xff]   ;;  %v1872_v40 = vld [vmem:[#allocation3 + $0xa4] ss:$8 sps:$4 sm:$0xff]   ;;  %v1876_v42 = vld [vmem:[#allocation3 + $0xa0] ss:$8 sps:$4 sm:$0xff]  }
  0x46   : > { %1328 = vmatpush1.bf16.msra.mxu0 %v1835_v15  ;;  %1247 = vmatprep.subr.bf16.mxu1 %v1836_v16  ;;  %v1874_v41 = vld [vmem:[#allocation3 + $0x2a4] ss:$8 sps:$4 sm:$0xff]   ;;  %s1725_s27 = sshll.u32 %s194_s26, 4  ;;  %v1877_v43 = vld [vmem:[#allocation3 + $0x2a0] ss:$8 sps:$4 sm:$0xff]   ;;  %vm2269_vm2 = vmor %vm247_vm0, %vm248_vm1  ;;  %vm317_vm9 = vcmask 1041408  }
  0x47   : > { %1329 = vmatprep.subr.bf16.mxu0 %v1838_v17  ;;  %v1878_v45 = vld [vmem:[#allocation3 + $0xb4] ss:$8 sps:$4 sm:$0xff]   ;;  %s2276_s30 = scalar_lea.vmem %s2373_s0, %s1725_s27  ;;  %v1882_v47 = vld [vmem:[#allocation3 + $0xb0] ss:$8 sps:$4 sm:$0xff]   ;;  %v1884_v51 = vld [vmem:[#allocation3 + $0xc4] ss:$8 sps:$4 sm:$0xff]  }
  0x48   : > { %v1880_v46 = vld [vmem:[#allocation3 + $0x2b4] ss:$8 sps:$4 sm:$0xff]   ;;  %v1883_v48 = vld [vmem:[#allocation3 + $0x2b0] ss:$8 sps:$4 sm:$0xff]   ;;  %v1557_v50 = vld [vmem:[%s2276_s30 + $0x8] sm:$0xf] }
  0x49   : > { %1248 = vmatpush1.bf16.msra.mxu1 %v1840_v18  ;;  %v199_v49 = vld [vmem:[%s2276_s30] sm:$0xf]  ;;  %v1886_v52 = vld [vmem:[#allocation3 + $0x2c4] ss:$8 sps:$4 sm:$0xff]   ;;  %203 = vst [vmem:[#allocation2 + $0x4] sm:$0xf] %v1557_v50 }
  0x4a   : > { %1330 = vmatpush1.bf16.msra.mxu0 %v1841_v19  ;;  %1249 = vmatprep.subr.bf16.mxu1 %v1842_v20  ;;  %200 = vst [vmem:[#allocation2] sm:$0xf] %v199_v49  ;;  %v243_v53 = vld [vmem:[%s2276_s30] sm:$0xe]  ;;  %v244_v54 = vld [vmem:[%s2276_s30 + $0x4] sm:$0x1] }
  0x4b   : > { %1331 = vmatprep.subr.bf16.mxu0 %v1844_v21  ;;  %v1560_v55 = vrot.slane %v243_v53, 9  ;;  %v1561_v56 = vld [vmem:[%s2276_s30 + $0x8] sm:$0xe]  ;;  %v252_v57 = vrot.slane %v244_v54, 5  ;;  %v1562_v58 = vld [vmem:[%s2276_s30 + $0xc] sm:$0x1] }
  0x4c   : > { %v1563_v59 = vrot.slane %v1561_v56, 9  ;;  %v262_v60 = vrot.slane %v1562_v58, 5  ;;  %v1888_v61 = vld [vmem:[#allocation3 + $0xc0] ss:$8 sps:$4 sm:$0xff]   ;;  %v1890_v0 = vld [vmem:[#allocation3 + $0xd4] ss:$8 sps:$4 sm:$0xff]  }
  0x4d   : > { %1250 = vmatpush1.bf16.msra.mxu1 %v1846_v22  ;;  %v1889_v62 = vld [vmem:[#allocation3 + $0x2c0] ss:$8 sps:$4 sm:$0xff]   ;;  %v253_v63 = vsel %vm2269_vm2, %v1560_v55, %v252_v57  ;;  %v1892_v1 = vld [vmem:[#allocation3 + $0x2d4] ss:$8 sps:$4 sm:$0xff]   ;;  %v1894_v3 = vld [vmem:[#allocation3 + $0xd0] ss:$8 sps:$4 sm:$0xff]  }
  0x4e   : > { %1332 = vmatpush1.bf16.msra.mxu0 %v1847_v23  ;;  %1251 = vmatprep.subr.bf16.mxu1 %v1848_v24  ;;  %255 = vst [vmem:[#allocation2 + $0x10] sm:$0xf] %v253_v63  ;;  %v263_v2 = vsel %vm2269_vm2, %v1563_v59, %v262_v60  ;;  %v1895_v5 = vld [vmem:[#allocation3 + $0x2d0] ss:$8 sps:$4 sm:$0xff]   ;;  %v1896_v6 = vld [vmem:[#allocation3 + $0xe4] ss:$8 sps:$4 sm:$0xff]  }
  0x4f   : > { %1333 = vmatprep.subr.bf16.mxu0 %v1850_v25  ;;  %265 = vst [vmem:[#allocation2 + $0x14] sm:$0xf] %v263_v2  ;;  %v1898_v8 = vld [vmem:[#allocation3 + $0x2e4] ss:$8 sps:$4 sm:$0xff]   ;;  %v1900_v9 = vld [vmem:[#allocation3 + $0xe0] ss:$8 sps:$4 sm:$0xff]  }
  0x50   : > { %v1901_v10 = vld [vmem:[#allocation3 + $0x2e0] ss:$8 sps:$4 sm:$0xff]   ;;  %v1902_v11 = vld [vmem:[#allocation3 + $0xf4] ss:$8 sps:$4 sm:$0xff]   ;;  %v1906_v15 = vld [vmem:[#allocation3 + $0xf0] ss:$8 sps:$4 sm:$0xff]  }
  0x51   : > { %1252 = vmatpush1.bf16.msra.mxu1 %v1852_v26  ;;  %v326_v4 = vld [vmem:[#allocation2] sm:$0xff]  ;;  %v1907_v16 = vld [vmem:[#allocation3 + $0x2f0] ss:$8 sps:$4 sm:$0xff]   ;;  %v1912_v17 = vld [vmem:[#allocation3 + $0x104] ss:$8 sps:$4 sm:$0xff]   ;;  %vm318_vm10 = vcmask 1045508  }
  0x52   : > { %1334 = vmatpush1.bf16.msra.mxu0 %v1853_v27  ;;  %1253 = vmatprep.subr.bf16.mxu1 %v1854_v28  ;;  %v1568_v7 = vcombine.high %v326_v4, %v326_v4  ;;  %v1904_v12 = vld [vmem:[#allocation3 + $0x2f4] ss:$8 sps:$4 sm:$0xff]   ;;  %v1917_v18 = vld [vmem:[#allocation3 + $0x304] ss:$8 sps:$4 sm:$0xff]   ;;  %v1567_v19 = vcombine.low %v326_v4, %v326_v4  ;;  %v1910_v20 = vld [vmem:[#allocation3 + $0x100] ss:$8 sps:$4 sm:$0xff]  }
  0x53   : > { %1335 = vmatprep.subr.bf16.mxu0 %v1856_v29  ;;  %v1915_v22 = vld [vmem:[#allocation3 + $0x300] ss:$8 sps:$4 sm:$0xff]   ;;  %v1920_v23 = vld [vmem:[#allocation3 + $0x114] ss:$8 sps:$4 sm:$0xff]   ;;  %v1918_v25 = vld [vmem:[#allocation3 + $0x110] ss:$8 sps:$4 sm:$0xff]  }
  0x54   : > { %1271 = vmatprep.mubr.bf16.mxu1 %v1568_v7  ;;  %v1923_v24 = vld [vmem:[#allocation3 + $0x314] ss:$8 sps:$4 sm:$0xff]   ;;  %v1921_v26 = vld [vmem:[#allocation3 + $0x310] ss:$8 sps:$4 sm:$0xff]   ;;  %v1926_v27 = vld [vmem:[#allocation3 + $0x124] ss:$8 sps:$4 sm:$0xff]  }
  0x55   : > { %1254 = vmatpush1.bf16.msra.mxu1 %v1858_v30  ;;  %v1929_v28 = vld [vmem:[#allocation3 + $0x324] ss:$8 sps:$4 sm:$0xff]   ;;  %v1924_v29 = vld [vmem:[#allocation3 + $0x120] ss:$8 sps:$4 sm:$0xff]   ;;  %vm206_vm3 = vsmask.f32 3328  ;;  %vm319_vm11 = vmor %vm317_vm9, %vm318_vm10 }
  0x56   : > { %1336 = vmatpush1.bf16.msra.mxu0 %v1859_v31  ;;  %1255 = vmatprep.subr.bf16.mxu1 %v1860_v32  ;;  %v328_v13 = vld [vmem:[#allocation2 + $0x10] sm:$0xff]  ;;  %v1927_v30 = vld [vmem:[#allocation3 + $0x320] ss:$8 sps:$4 sm:$0xff]   ;;  %v1932_v31 = vld [vmem:[#allocation3 + $0x134] ss:$8 sps:$4 sm:$0xff]   ;;  %s190_s6 = sand.u32 1, %s2131_s13  }
  0x57   : > { %1337 = vmatprep.subr.bf16.mxu0 %v1862_v33  ;;  %v1572_v14 = vcombine.high %v328_v13, %v328_v13  ;;  %v1571_v21 = vcombine.low %v328_v13, %v328_v13  ;;  %v1935_v32 = vld [vmem:[#allocation3 + $0x334] ss:$8 sps:$4 sm:$0xff]   ;;  %v1930_v33 = vld [vmem:[#allocation3 + $0x130] ss:$8 sps:$4 sm:$0xff]   ;;  %vm207_vm4 = vsmask.f32 7440 }
  0x58   : > { %v1953_v44 = vld [vmem:[#allocation3 + $0x364] ss:$8 sps:$4 sm:$0xff]   ;;  %vm268_vm5 = vsmask.f32 2304  ;;  %vm269_vm6 = vsmask.f32 6416  ;;  %vm2298_vm7 = vmor %vm206_vm3, %vm207_vm4 }
  0x59   : > { %1256 = vmatpush1.bf16.msra.mxu1 %v1864_v34  ;;  %1353 = vmatprep.mubr.bf16.mxu0 %v1572_v14  ;;  %v1933_v34 = vld [vmem:[#allocation3 + $0x330] ss:$8 sps:$4 sm:$0xff]   ;;  %v204_v49 = vld [vmem:[%s2276_s30] sm:$0xf]  ;;  %v205_v50 = vld [vmem:[%s2276_s30 + $0x4] sm:$0x1] }
  0x5a   : > { %1338 = vmatpush1.bf16.msra.mxu0 %v1865_v35  ;;  %1257 = vmatprep.subr.bf16.mxu1 %v1866_v36  ;;  %v1938_v35 = vld [vmem:[#allocation3 + $0x144] ss:$8 sps:$4 sm:$0xff]   ;;  %v213_v53 = vshll.u32 %v204_v49, 16  ;;  %v219_v54 = vshll.u32 %v205_v50, 16  ;;  %v1559_v55 = vld [vmem:[%s2276_s30 + $0xc] sm:$0x1]  ;;  %vm2304_vm8 = vmor %vm268_vm5, %vm269_vm6 }
  0x5b   : > { %1339 = vmatprep.subr.bf16.mxu0 %v1868_v37  ;;  %v1941_v36 = vld [vmem:[#allocation3 + $0x344] ss:$8 sps:$4 sm:$0xff]   ;;  %v1936_v37 = vld [vmem:[#allocation3 + $0x140] ss:$8 sps:$4 sm:$0xff]   ;;  %v1954_v57 = vld [vmem:[#allocation3 + $0x170] ss:$8 sps:$4 sm:$0xff]  }
  0x5c   : > { %v1957_v58 = vld [vmem:[#allocation3 + $0x370] ss:$8 sps:$4 sm:$0xff]   ;;  %v237_v60 = vshll.u32 %v1559_v55, 16  ;;  %v1962_v63 = vld [vmem:[#allocation3 + $0x184] ss:$8 sps:$4 sm:$0xff]   ;;  %v215_v2 = vrot.slane %v213_v53, 5 }
  0x5d   : > { %1258 = vmatpush1.bf16.msra.mxu1 %v1870_v38  ;;  %v1939_v38 = vld [vmem:[#allocation3 + $0x340] ss:$8 sps:$4 sm:$0xff]   ;;  %v313_v53 = vld [vmem:[%s2276_s30] sm:$0xc]  ;;  %s1554_s7 = sshll.u32 %s190_s6, 4  ;;  %s1726_s8 = sshll.u32 %s2139_s15, 8 }
  0x5e   : > { %1340 = vmatpush1.bf16.msra.mxu0 %v1871_v39  ;;  %1259 = vmatprep.subr.bf16.mxu1 %v1872_v40  ;;  %v1944_v39 = vld [vmem:[#allocation3 + $0x154] ss:$8 sps:$4 sm:$0xff]   ;;  %v239_v7 = vrot.slane %v237_v60, 5  ;;  %v1981_v60 = vld [vmem:[#allocation3 + $0x3b0] ss:$8 sps:$4 sm:$0xff]   ;;  %s192_s9 = scalar_lea.vmem [#allocation6], %s1554_s7  ;;  %s2326_s19 = scalar_lea.hbm %s2376_s3, %s1726_s8 }
  0x5f   : > { %1341 = vmatprep.subr.bf16.mxu0 %v1874_v41  ;;  %v1947_v40 = vld [vmem:[#allocation3 + $0x354] ss:$8 sps:$4 sm:$0xff]   ;;  %v1942_v41 = vld [vmem:[#allocation3 + $0x150] ss:$8 sps:$4 sm:$0xff]   ;;  %s1465_s10 = sshll.u32 %s192_s9, 4  ;;  %s1449_s15 = scalar_lea.sflag [#allocation5], %s190_s6  ;;  %s2328_s10 = int_to_ptr.vmem [resolvable:$true] %s1465_s10 }
  0x60   : > { %s2065_s21 = scalar_lea.vmem %s2328_s10, 256  ;;  %p2394_p10 = scmp.ne.s32.totalorder %s2381_s22, 0 }
  0x61   : > { %1260 = vmatpush1.bf16.msra.mxu1 %v1876_v42  ;;  %v1945_v42 = vld [vmem:[#allocation3 + $0x350] ss:$8 sps:$4 sm:$0xff]   ;;  %p2066_p8 = scmp.ne.s32.totalorder %s2328_s10, %s2065_s21  ;;  %s2153_s23 = smov [#allocation6]  }
  0x62   : > { %1342 = vmatpush1.bf16.msra.mxu0 %v1877_v43  ;;  %1261 = vmatprep.subr.bf16.mxu1 %v1878_v45  ;;  %v1950_v43 = vld [vmem:[#allocation3 + $0x164] ss:$8 sps:$4 sm:$0xff]   ;;  %v1948_v45 = vld [vmem:[#allocation3 + $0x160] ss:$8 sps:$4 sm:$0xff]   ;;  %s2069_s26 = sshll.u32 %s2153_s23, 4  ;;  %s2070_s26 = int_to_ptr.vmem [resolvable:$false] %s2069_s26 }
  0x63   : > { %1343 = vmatprep.subr.bf16.mxu0 %v1880_v46  ;;  %v1951_v46 = vld [vmem:[#allocation3 + $0x360] ss:$8 sps:$4 sm:$0xff]   ;;  %p2067_p11 = pnand %p2066_p8, %p2394_p10  ;;  %s2071_s27 = scalar_lea.vmem %s2070_s26, 512 }
  0x64   : > { %p2072_p1 = scmp.lt.s32.totalorder %s2328_s10, %s2070_s26  ;;  %p2073_p3 = scmp.lt.s32.totalorder %s2071_s27, %s2065_s21 }
  0x65   : > { %1262 = vmatpush1.bf16.msra.mxu1 %v1882_v47  ;;  %v1956_v47 = vld [vmem:[#allocation3 + $0x174] ss:$8 sps:$4 sm:$0xff]   ;;  %p2068_p13 = pneg %p2067_p11 }
  0x66   : > { %1344 = vmatpush1.bf16.msra.mxu0 %v1883_v48  ;;  %1263 = vmatprep.subr.bf16.mxu1 %v1884_v51  ;;  %v1959_v48 = vld [vmem:[#allocation3 + $0x374] ss:$8 sps:$4 sm:$0xff]   ;;  %v1558_v51 = vld [vmem:[%s2276_s30 + $0x8] sm:$0xf]  ;;  %p2074_p5 = por %p2073_p3, %p2072_p1 }
  0x67   : > { %1345 = vmatprep.subr.bf16.mxu0 %v1886_v52  ;;  %v210_v52 = vshrl.u32 %v204_v49, 16  ;;  %v228_v56 = vshrl.u32 %v1558_v51, 16  ;;  %v231_v59 = vshll.u32 %v1558_v51, 16  ;;  %v1975_v49 = vld [vmem:[#allocation3 + $0x3a0] ss:$8 sps:$4 sm:$0xff]  }
  0x68   : > { %v1980_v51 = vld [vmem:[#allocation3 + $0x1b4] ss:$8 sps:$4 sm:$0xff]   ;;  %p2075_p6 = pnand %p2074_p5, %p2068_p13 }
  0x69   : > { %1264 = vmatpush1.bf16.msra.mxu1 %v1888_v61  ;;  %v266_v61 = vld [vmem:[%s2276_s30] sm:$0xe]  ;;  %v230_v4 = vrot.slane %v228_v56, 4  ;;  %v1566_v56 = vrot.slane %v313_v53, 10 }
  0x6a   : > { %1346 = vmatpush1.bf16.msra.mxu0 %v1889_v62  ;;  %1265 = vmatprep.subr.bf16.mxu1 %v1890_v0  ;;  %v267_v62 = vld [vmem:[%s2276_s30 + $0x4] sm:$0x3]  ;;  %v1965_v0 = vld [vmem:[#allocation3 + $0x384] ss:$8 sps:$4 sm:$0xff]  }
  0x6b   : > { %1347 = vmatprep.subr.bf16.mxu0 %v1892_v1  ;;  %v212_v1 = vrot.slane %v210_v52, 4  ;;  %v284_v13 = vshll.u32 %v267_v62, 16  ;;  %v1983_v52 = vld [vmem:[#allocation3 + $0x3b4] ss:$8 sps:$4 sm:$0xff]  }
  0x6d   : > { %1266 = vmatpush1.bf16.msra.mxu1 %v1894_v3  ;;  %v221_v3 = vrot.slane %v219_v54, 5  ;;  %v314_v54 = vld [vmem:[%s2276_s30 + $0x4] sm:$0x3] }
  0x6e   : > { %1348 = vmatpush1.bf16.msra.mxu0 %v1895_v5  ;;  %1267 = vmatprep.subr.bf16.mxu1 %v1896_v6  ;;  %v1564_v5 = vld [vmem:[%s2276_s30 + $0x8] sm:$0xe]  ;;  %v233_v6 = vrot.slane %v231_v59, 5  ;;  %v1978_v59 = vld [vmem:[#allocation3 + $0x1b0] ss:$8 sps:$4 sm:$0xff]  }
  0x6f   : > { %1349 = vmatprep.subr.bf16.mxu0 %v1898_v8  ;;  %v272_v8 = vshrl.u32 %v266_v61, 16  ;;  %v294_v14 = vshrl.u32 %v1564_v5, 16 }
  0x71   : > { %1268 = vmatpush1.bf16.msra.mxu1 %v1900_v9  ;;  %v275_v9 = vshll.u32 %v266_v61, 16 }
  0x72   : > { %1350 = vmatpush1.bf16.msra.mxu0 %v1901_v10  ;;  %1269 = vmatprep.subr.bf16.mxu1 %v1902_v11  ;;  %v1565_v10 = vld [vmem:[%s2276_s30 + $0xc] sm:$0x3]  ;;  %v216_v11 = vor.u32 %v215_v2, %v212_v1 }
  0x73   : > { %1351 = vmatprep.subr.bf16.mxu0 %v1904_v12  ;;  %v281_v12 = vshrl.u32 %v267_v62, 16  ;;  %v1986_v62 = vld [vmem:[#allocation3 + $0x1c4] ss:$8 sps:$4 sm:$0xff]   ;;  %v1984_v1 = vld [vmem:[#allocation3 + $0x1c0] ss:$8 sps:$4 sm:$0xff]  }
  0x74   : > { %v1987_v2 = vld [vmem:[#allocation3 + $0x3c0] ss:$8 sps:$4 sm:$0xff]  }
  0x75   : > { %1270 = vmatpush1.bf16.msra.mxu1 %v1906_v15  ;;  %v2005_v15 = vld [vmem:[#allocation3 + $0x3f0] ss:$8 sps:$4 sm:$0xff]  }
  0x76   : > { %1352 = vmatpush1.bf16.msra.mxu0 %v1907_v16  ;;  %1280 = vmatprep.subr.bf16.mxu1 %v1912_v17  ;;  %v234_v16 = vor.u32 %v233_v6, %v230_v4  ;;  %v274_v17 = vrot.slane %v272_v8, 5  ;;  %v1992_v4 = vld [vmem:[#allocation3 + $0x1d4] ss:$8 sps:$4 sm:$0xff]   ;;  %v1990_v6 = vld [vmem:[#allocation3 + $0x1d0] ss:$8 sps:$4 sm:$0xff]  }
  0x77   : > { %1362 = vmatprep.subr.bf16.mxu0 %v1917_v18  ;;  %v277_v18 = vrot.slane %v275_v9, 6  ;;  %v1998_v8 = vld [vmem:[#allocation3 + $0x1e4] ss:$8 sps:$4 sm:$0xff]  }
  0x78   : > { %1272 = vmatmul.mubr.bf16.vlgmr.msra.gmra.mrb[0].mxu1 %v1567_v19  ;;  %v297_v19 = vshll.u32 %v1564_v5, 16  ;;  %v1995_v5 = vld [vmem:[#allocation3 + $0x3d4] ss:$8 sps:$4 sm:$0xff]   ;;  %v2001_v9 = vld [vmem:[#allocation3 + $0x3e4] ss:$8 sps:$4 sm:$0xff]  }
  0x79   : > { %1354 = vmatmul.mubr.bf16.vlgmr.msra.gmra.mrb[0].mxu0 %v1571_v21  ;;  %1281 = vmatpush1.bf16.msra.mxu1 %v1910_v20  ;;  %v1960_v20 = vld [vmem:[#allocation3 + $0x180] ss:$8 sps:$4 sm:$0xff]   ;;  %v217_v21 = vrot.slane %v216_v11, 4 }
  0x7a   : > { %1363 = vmatpush1.bf16.msra.mxu0 %v1915_v22  ;;  %1282 = vmatprep.subr.bf16.mxu1 %v1920_v23  ;;  %v283_v22 = vrot.slane %v281_v12, 5  ;;  %v286_v23 = vrot.slane %v284_v13, 6  ;;  %v1999_v11 = vld [vmem:[#allocation3 + $0x3e0] ss:$8 sps:$4 sm:$0xff]   ;;  %v2004_v12 = vld [vmem:[#allocation3 + $0x1f4] ss:$8 sps:$4 sm:$0xff]  }
  0x7b   : > { %1364 = vmatprep.subr.bf16.mxu0 %v1923_v24  ;;  %v296_v24 = vrot.slane %v294_v14, 5  ;;  %v2007_v13 = vld [vmem:[#allocation3 + $0x3f4] ss:$8 sps:$4 sm:$0xff]   ;;  %v2002_v14 = vld [vmem:[#allocation3 + $0x1f0] ss:$8 sps:$4 sm:$0xff]  }
  0x7d   : > { %1283 = vmatpush1.bf16.msra.mxu1 %v1918_v25  ;;  %v1963_v25 = vld [vmem:[#allocation3 + $0x380] ss:$8 sps:$4 sm:$0xff]  }
  0x7e   : > { %1365 = vmatpush1.bf16.msra.mxu0 %v1921_v26  ;;  %1284 = vmatprep.subr.bf16.mxu1 %v1926_v27  ;;  %v235_v26 = vrot.slane %v234_v16, 4  ;;  %v2014_v16 = vld [vmem:[#allocation3 + $0x404] ss:$8 sps:$4 sm:$0xff]  }
  0x7f   : > { %1366 = vmatprep.subr.bf16.mxu0 %v1929_v28  ;;  %v278_v28 = vor.u32 %v277_v18, %v274_v17  ;;  %v2026_v27 = vld [vmem:[#allocation3 + $0x444] ss:$8 sps:$4 sm:$0xff]  }
  0x81   : > { %1285 = vmatpush1.bf16.msra.mxu1 %v1924_v29  ;;  %v299_v29 = vrot.slane %v297_v19, 6  ;;  %v2012_v19 = vld [vmem:[#allocation3 + $0x400] ss:$8 sps:$4 sm:$0xff]  }
  0x82   : > { %1367 = vmatpush1.bf16.msra.mxu0 %v1927_v30  ;;  %1286 = vmatprep.subr.bf16.mxu1 %v1932_v31  ;;  %v303_v30 = vshrl.u32 %v1565_v10, 16  ;;  %v1968_v31 = vld [vmem:[#allocation3 + $0x194] ss:$8 sps:$4 sm:$0xff]  }
  0x83   : > { %1368 = vmatprep.subr.bf16.mxu0 %v1935_v32  ;;  %v1971_v32 = vld [vmem:[#allocation3 + $0x394] ss:$8 sps:$4 sm:$0xff]  }
  0x85   : > { %1287 = vmatpush1.bf16.msra.mxu1 %v1930_v33  ;;  %v222_v33 = vsel %vm2298_vm7, %v217_v21, %v221_v3  ;;  %v2015_v21 = vld [vmem:[#allocation3 + $0x410] ss:$8 sps:$4 sm:$0xff]  }
  0x86   : > { %1369 = vmatpush1.bf16.msra.mxu0 %v1933_v34  ;;  %1288 = vmatprep.subr.bf16.mxu1 %v1938_v35  ;;  %v287_v34 = vor.u32 %v286_v23, %v283_v22  ;;  %v306_v35 = vshll.u32 %v1565_v10, 16  ;;  %224 = vst [vmem:[#allocation2 + $0x8] sm:$0xf] %v222_v33  ;;  %v1996_v10 = vld [vmem:[#allocation3 + $0x1e0] ss:$8 sps:$4 sm:$0xff]   ;;  %v2152_v22 = vmov 0  }
  0x87   : > { %1370 = vmatprep.subr.bf16.mxu0 %v1941_v36  ;;  %v240_v36 = vsel %vm2298_vm7, %v235_v26, %v239_v7  ;;  %v1993_v7 = vld [vmem:[#allocation3 + $0x3d0] ss:$8 sps:$4 sm:$0xff]   ;;  %v2020_v23 = vld [vmem:[#allocation3 + $0x424] ss:$8 sps:$4 sm:$0xff]   ;;  %v2035_v33 = vld [vmem:[#allocation3 + $0x474] ss:$8 sps:$4 sm:$0xff]  }
  0x88   : > { %242 = vst [vmem:[#allocation2 + $0xc] sm:$0xf] %v240_v36  ;;  %v2021_v26 = vld [vmem:[#allocation3 + $0x430] ss:$8 sps:$4 sm:$0xff]  }
  0x89   : > { %1289 = vmatpush1.bf16.msra.mxu1 %v1936_v37  ;;  %v279_v37 = vrot.slane %v278_v28, 4  ;;  %v2024_v28 = vld [vmem:[#allocation3 + $0x440] ss:$8 sps:$4 sm:$0xff]  }
  0x8a   : > { %1371 = vmatpush1.bf16.msra.mxu0 %v1939_v38  ;;  %1290 = vmatprep.subr.bf16.mxu1 %v1944_v39  ;;  %v300_v38 = vor.u32 %v299_v29, %v296_v24  ;;  %v305_v39 = vrot.slane %v303_v30, 5  ;;  %v2018_v24 = vld [vmem:[#allocation3 + $0x420] ss:$8 sps:$4 sm:$0xff]   ;;  %v2029_v29 = vld [vmem:[#allocation3 + $0x454] ss:$8 sps:$4 sm:$0xff]  }
  0x8b   : > { %1372 = vmatprep.subr.bf16.mxu0 %v1947_v40  ;;  %v1966_v40 = vld [vmem:[#allocation3 + $0x190] ss:$8 sps:$4 sm:$0xff]  }
  0x8c   : > { %v2027_v30 = vld [vmem:[#allocation3 + $0x450] ss:$8 sps:$4 sm:$0xff]  }
  0x8d   : > { %1291 = vmatpush1.bf16.msra.mxu1 %v1942_v41  ;;  %v308_v41 = vrot.slane %v306_v35, 6 }
  0x8e   : > { %1373 = vmatpush1.bf16.msra.mxu0 %v1945_v42  ;;  %1292 = vmatprep.subr.bf16.mxu1 %v1950_v43  ;;  %v1969_v42 = vld [vmem:[#allocation3 + $0x390] ss:$8 sps:$4 sm:$0xff]   ;;  %v1974_v43 = vld [vmem:[#allocation3 + $0x1a4] ss:$8 sps:$4 sm:$0xff]  }
  0x8f   : > { %1374 = vmatprep.subr.bf16.mxu0 %v1953_v44  ;;  %v288_v44 = vsel %vm2304_vm8, %v279_v37, %v287_v34  ;;  %v327_v55 = vld [vmem:[#allocation2 + $0x8] sm:$0xff]  ;;  %v2033_v34 = vld [vmem:[#allocation3 + $0x470] ss:$8 sps:$4 sm:$0xff]  }
  0x90   : > { %290 = vst [vmem:[#allocation2 + $0x18] sm:$0xf] %v288_v44  ;;  %v1569_v17 = vcombine.low %v327_v55, %v327_v55 }
  0x91   : > { %1293 = vmatpush1.bf16.msra.mxu1 %v1948_v45  ;;  %v301_v45 = vrot.slane %v300_v38, 4 }
  0x92   : > { %1375 = vmatpush1.bf16.msra.mxu0 %v1951_v46  ;;  %1294 = vmatprep.subr.bf16.mxu1 %v1956_v47  ;;  %v1977_v46 = vld [vmem:[#allocation3 + $0x3a4] ss:$8 sps:$4 sm:$0xff]   ;;  %v309_v47 = vor.u32 %v308_v41, %v305_v39 }
  0x93   : > { %1376 = vmatprep.subr.bf16.mxu0 %v1959_v48  ;;  %v1972_v48 = vld [vmem:[#allocation3 + $0x1a0] ss:$8 sps:$4 sm:$0xff]  }
  0x94   : > { %v310_v50 = vsel %vm2304_vm8, %v301_v45, %v309_v47 }
  0x95   : > { %1295 = vmatpush1.bf16.msra.mxu1 %v1954_v57  ;;  %312 = vst [vmem:[#allocation2 + $0x1c] sm:$0xf] %v310_v50  ;;  %v322_v57 = vrot.slane %v314_v54, 6 }
  0x96   : > { %1377 = vmatpush1.bf16.msra.mxu0 %v1957_v58  ;;  %1296 = vmatprep.subr.bf16.mxu1 %v1962_v63  ;;  %v1570_v58 = vcombine.high %v327_v55, %v327_v55  ;;  %v1989_v63 = vld [vmem:[#allocation3 + $0x3c4] ss:$8 sps:$4 sm:$0xff]  }
  0x97   : > { %1378 = vmatprep.subr.bf16.mxu0 %v1965_v0  ;;  %v323_v61 = vsel %vm319_vm11, %v1566_v56, %v322_v57 }
  0x98   : > { %325 = vst [vmem:[#allocation2 + $0x20] sm:$0xf] %v323_v61  ;;  %1312 = vmatprep.mubr.bf16.mxu1 %v1570_v58 }
  0x99   : > { %1297 = vmatpush1.bf16.msra.mxu1 %v1960_v20  ;;  %v2017_v20 = vld [vmem:[#allocation3 + $0x414] ss:$8 sps:$4 sm:$0xff]  }
  0x9a   : > { %1379 = vmatpush1.bf16.msra.mxu0 %v1963_v25  ;;  %1298 = vmatprep.subr.bf16.mxu1 %v1968_v31  ;;  %v2023_v25 = vld [vmem:[#allocation3 + $0x434] ss:$8 sps:$4 sm:$0xff]   ;;  %v2032_v31 = vld [vmem:[#allocation3 + $0x464] ss:$8 sps:$4 sm:$0xff]  }
  0x9b   : > { %1380 = vmatprep.subr.bf16.mxu0 %v1971_v32  ;;  %v2030_v32 = vld [vmem:[#allocation3 + $0x460] ss:$8 sps:$4 sm:$0xff]  }
  0x9c   : > { %v329_v0 = vld [vmem:[#allocation2 + $0x18] sm:$0xff] }
  0x9d   : > { %1299 = vmatpush1.bf16.msra.mxu1 %v1966_v40  ;;  %v1574_v3 = vcombine.high %v329_v0, %v329_v0  ;;  %v1573_v18 = vcombine.low %v329_v0, %v329_v0  ;;  %v477_v40 = vlaneseq }
  0x9e   : > { %1381 = vmatpush1.bf16.msra.mxu0 %v1969_v42  ;;  %1300 = vmatprep.subr.bf16.mxu1 %v1974_v43  ;;  %v475_v43 = vld [vmem:[%s2375_s2] sm:$0x3] }
  0x9f   : > { %1382 = vmatprep.subr.bf16.mxu0 %v1977_v46  ;;  %1394 = vmatprep.mubr.bf16.mxu0 %v1574_v3  ;;  %v2036_v35 = vld [vmem:[#allocation2 + $0x20] ss:$0 sps:$4 sm:$0xff]   ;;  %v478_v41 = vshrl.u32 %v477_v40, 7 }
  0xa1   : > { %1301 = vmatpush1.bf16.msra.mxu1 %v1972_v48  ;;  %v479_v42 = vsub.s32 0, %v478_v41  ;;  %v483_v44 = vsub.s32 1, %v478_v41 }
  0xa2   : > { %1383 = vmatpush1.bf16.msra.mxu0 %v1975_v49  ;;  %1302 = vmatprep.subr.bf16.mxu1 %v1980_v51 }
  0xa3   : > { %1384 = vmatprep.subr.bf16.mxu0 %v1983_v52  ;;  %v480_v45 = vrot.slane %v475_v43, %v479_v42  ;;  %v484_v46 = vrot.slane %v475_v43, %v483_v44 }
  0xa5   : > { %1303 = vmatpush1.bf16.msra.mxu1 %v1978_v59 }
  0xa6   : > { %1385 = vmatpush1.bf16.msra.mxu0 %v1981_v60  ;;  %1304 = vmatprep.subr.bf16.mxu1 %v1986_v62 }
  0xa7   : > { %1386 = vmatprep.subr.bf16.mxu0 %v1989_v63 }
  0xa9   : > { %1305 = vmatpush1.bf16.msra.mxu1 %v1984_v1 }
  0xaa   : > { %1387 = vmatpush1.bf16.msra.mxu0 %v1987_v2  ;;  %1306 = vmatprep.subr.bf16.mxu1 %v1992_v4 }
  0xab   : > { %1388 = vmatprep.subr.bf16.mxu0 %v1995_v5 }
  0xad   : > { %1307 = vmatpush1.bf16.msra.mxu1 %v1990_v6 }
  0xae   : > { %1389 = vmatpush1.bf16.msra.mxu0 %v1993_v7  ;;  %1308 = vmatprep.subr.bf16.mxu1 %v1998_v8 }
  0xaf   : > { %1390 = vmatprep.subr.bf16.mxu0 %v2001_v9 }
  0xb1   : > { %1309 = vmatpush1.bf16.msra.mxu1 %v1996_v10 }
  0xb2   : > { %1391 = vmatpush1.bf16.msra.mxu0 %v1999_v11  ;;  %1310 = vmatprep.subr.bf16.mxu1 %v2004_v12 }
  0xb3   : > { %1392 = vmatprep.subr.bf16.mxu0 %v2007_v13 }
  0xb5   : > { %1311 = vmatpush1.bf16.msra.mxu1 %v2002_v14 }
  0xb6   : > { %1393 = vmatpush1.bf16.msra.mxu0 %v2005_v15 }
  0xb7   : > { %1403 = vmatprep.subr.bf16.mxu0 %v2014_v16 }
  0xb8   : > { %1313 = vmatmul.mubr.bf16.vlgmr.msra.gmra.mrb[0].mxu1 %v1569_v17 }
  0xb9   : > { %1395 = vmatmul.mubr.bf16.vlgmr.msra.gmra.mrb[0].mxu0 %v1573_v18 }
  0xba   : > { %1404 = vmatpush1.bf16.msra.mxu0 %v2012_v19  ;;  %1435 = vmatprep.mubr.bf16.mxu0 %v2152_v22 }
  0xbb   : > { %1405 = vmatprep.subr.bf16.mxu0 %v2017_v20 }
  0xbe   : > { %1406 = vmatpush1.bf16.msra.mxu0 %v2015_v21 }
  0xbf   : > { %1407 = vmatprep.subr.bf16.mxu0 %v2020_v23 }
  0xc2   : > { %1408 = vmatpush1.bf16.msra.mxu0 %v2018_v24 }
  0xc3   : > { %1409 = vmatprep.subr.bf16.mxu0 %v2023_v25 }
  0xc6   : > { %1410 = vmatpush1.bf16.msra.mxu0 %v2021_v26 }
  0xc7   : > { %1411 = vmatprep.subr.bf16.mxu0 %v2026_v27 }
  0xca   : > { %1412 = vmatpush1.bf16.msra.mxu0 %v2024_v28 }
  0xcb   : > { %1413 = vmatprep.subr.bf16.mxu0 %v2029_v29 }
  0xce   : > { %1414 = vmatpush1.bf16.msra.mxu0 %v2027_v30 }
  0xcf   : > { %1415 = vmatprep.subr.bf16.mxu0 %v2032_v31 }
  0xd2   : > { %1416 = vmatpush1.bf16.msra.mxu0 %v2030_v32 }
  0xd3   : > { %1417 = vmatprep.subr.bf16.mxu0 %v2035_v33 }
  0xd6   : > { %1418 = vmatpush1.bf16.msra.mxu0 %v2033_v34 }
  0xd9   : > { %1436 = vmatmul.mubr.bf16.vlgmr.msra.gmra.mrb[0].mxu0 %v2036_v35 }
 0x18b   : > { %v1314_v36 = vpop.f32.mrb[0].mxu1 }
 0x18c   : > { %v1316_v37 = vpop.f32.mrb[1].mxu1  ;;  %v1727_v47 = vadd.f32 %v1314_v36, %v480_v45 }
 0x18d   : > { %v1318_v38 = vpop.f32.mrb[2].mxu1  ;;  %v1729_v48 = vadd.f32 %v1316_v37, %v484_v46 }
 0x18e   : > { %v1319_v39 = vpop.f32.mrb[3].mxu1 }
 0x1ac   : > { %v1437_v49 = vpop.f32.mrb[0].mxu0 }
 0x1ad   : > { %v1728_v50 = vadd.f32 %v1727_v47, %v1437_v49  ;;  %v1439_v51 = vpop.f32.mrb[1].mxu0 }
 0x1ae   : > { %v1730_v52 = vadd.f32 %v1729_v48, %v1439_v51  ;;  %v1441_v53 = vpop.f32.mrb[2].mxu0 }
 0x1af   : > { %v1444_v54 = vmax.f32 %v1728_v50, 0.0  ;;  %v1442_v55 = vpop.f32.mrb[3].mxu0 }
 0x1b0   : > { %v1445_v56 = vmax.f32 %v1730_v52, 0.0 }
 0x1b1   : > { %1446 = vst [vmem:[%s192_s9] sm:$0xff] %v1444_v54 }
 0x1b2   : > { %1447 = vst [vmem:[%s192_s9 + $0x8] sm:$0xff] %v1445_v56 }
 0x1b3   : > { %2078 = shalt.err (!%p2075_p6)
}
 0x1b4   : > { %s2079_s28 = scalar_lea.hbm %s2326_s19, 256  ;;  %s2083_s4 = scalar_lea.hbm %s2376_s3, 512 }
 0x1b5   : > { %p2080_p7 = scmp.ne.s32.totalorder %s2326_s19, %s2079_s28  ;;  %p2084_p0 = scmp.lt.u32.totalorder %s2326_s19, %s2376_s3 }
 0x1b6   : > { %p2085_p2 = scmp.lt.u32.totalorder %s2083_s4, %s2079_s28  ;;  %p2087_p8 = scmp.lt.u32.totalorder %s2079_s28, %s2326_s19 }
 0x1b7   : > { %p2081_p9 = pnand %p2080_p7, %p2394_p10 }
 0x1b8   : > { %p2086_p4 = por %p2085_p2, %p2084_p0 }
 0x1b9   : > { %p2082_p12 = pneg %p2081_p9 }
 0x1ba   : > { %p2088_p11 = por %p2087_p8, %p2086_p4 }
 0x1bc   : > { %p2089_p13 = pnand %p2088_p11, %p2082_p12 }
 0x1be   : > { %2092 = shalt.err (!%p2089_p13)
}
 0x1bf   : > { %1747 = dma.vmem_to_hbm [thread:$0]  (%p2394_p10), %s2328_s10, 256, %s2326_s19, %s1449_s15  }
 0x1c0 PF: > { %p1759_p1 = scmp.ge.s32.totalorder %s2147_s17, 2  ;;  %s1477_s7 = sand.u32 1, %s2127_s12  }
 0x1c1   : > { %p2395_p3 = scmp.ne.s32.totalorder %s2382_s24, 0  ;;  %s1478_s8 = scalar_lea.sflag [#allocation5], %s1477_s7 }
 0x1c3   : > { %p1754_p5 = pnand %p1759_p1, %p2395_p3 }
 0x1c5   : > { %2122 = dma.done.wait (!%p1754_p5), %s1478_s8, 256  }
 0x1c6   : > { %2124 = vsyncadd (!%p1754_p5), %s1478_s8, 4294967040  ;;  %s17_s17 = sadd.s32 1, %s2147_s17   ;;  %s2396_s12 = smov %s2131_s13 }
 0x1c7   : > { %p14_p6 = scmp.ge.s32.totalorder %s17_s17, 4   ;;  %s2397_s13 = smov %s2135_s14 }
 0x1c8   : > { %s2398_s14 = smov %s2227_s25  ;;  %s2399_s15 = smov %s2143_s16 }
 0x1c9   : > { %s2400_s16 = smov %s2402_s20  ;;  %16 = sbr.rel (!%p14_p6) target bundleno = 5 (0x5), region = 73 }
 0x1d0   :  { %1483 = vsyncpa [#allocation4], 1 }
 0x1d1   :  { %1485 = vsyncpa [#allocation4 + $0x1], 1 }
 0x1d2   :  { %1486 = vsyncpa [#allocation5], 1 }
 0x1d3   :  { %1488 = vsyncpa [#allocation5 + $0x1], 1 }

</bundles_post_ra>
